<compile_context>
chip_gen: v5e
topology: v5e:2x2
jax: 0.10.0
libtpu: 0.0.40
codegen_flags: <defaults>
</compile_context>

<pallas_src>
import numpy as np
import jax
import jax.numpy as jnp
from jax.experimental import pallas as pl
from jax.experimental.pallas import tpu as pltpu


def _make_dino_kernel(v_t, v_s, student_temp, teacher_temp, center_momentum):
    inv_tt = np.float32(1.0 / teacher_temp)
    inv_st = np.float32(1.0 / student_temp)
    mom = np.float32(center_momentum)
    one_minus_mom = np.float32(1.0 - center_momentum)
    inv_vt = np.float32(1.0 / v_t)

    def kernel(t_ref, s_ref, c_ref, loss_ref, center_ref):
        # t_ref: (v_t, tB, D) teacher logits for this batch tile
        # s_ref: (v_s, tB, D) student logits for this batch tile
        # c_ref: (tB, D)      current center slice (f32)
        # loss_ref:   (8, D)  full-vreg, lane-dense per-tile loss partial
        # center_ref: (tB, D) updated center slice (aliased with center input)
        c = c_ref[...].astype(jnp.float32)

        # --- teacher softmaxes: computed exactly once per teacher view -------
        qs = []
        q_sum = None          # Q = sum_iq q_iq
        t_sum = None          # raw teacher-logit view sum (for center update)
        for iq in range(v_t):
            t = t_ref[iq].astype(jnp.float32)                 # (tB, D)
            t_sum = t if t_sum is None else t_sum + t
            tz = (t - c) * inv_tt
            tz = tz - jnp.max(tz, axis=-1, keepdims=True)     # XLU lane max
            te = jnp.exp(tz)                                  # EUP
            denom = jnp.sum(te, axis=-1, keepdims=True)       # XLU lane sum
            q = te * pl.reciprocal(denom, approx=True)        # EUP vrcp
            qs.append(q)
            q_sum = q if q_sum is None else q_sum + q

        # --- student views streamed through the factored pair loop -----------
        #   sum_{iq} sum_{v != iq} -q_iq * log_p_v
        #     == sum_v -(Q - [v < v_t] * q_v) * log_p_v
        # Each log-softmax is consumed immediately -> no v_s live (tB, D) tiles.
        acc = jnp.zeros_like(c)                               # (tB, D)
        for v in range(v_s):
            sz = s_ref[v].astype(jnp.float32) * inv_st        # (tB, D)
            sz = sz - jnp.max(sz, axis=-1, keepdims=True)
            lse = jnp.log(jnp.sum(jnp.exp(sz), axis=-1, keepdims=True))
            log_p = sz - lse
            w = (q_sum - qs[v]) if v < v_t else q_sum
            acc = acc - w * log_p

        # Sublane-group reduction into a full-vreg (8, D) partial (unmasked
        # vst); final scalar reduction happens in the wrapper.
        tb = acc.shape[0]
        part = acc[0:8, :]
        for g in range(1, tb // 8):
            part = part + acc[g * 8:(g + 1) * 8, :]
        loss_ref[...] = part

        # --- center momentum update (disjoint slice per grid step) -----------
        center_ref[...] = c * mom + (t_sum * inv_vt) * one_minus_mom

    return kernel


def _vmem_plan():
    """(vmem_limit_bytes, tile_budget_bytes, prefer_core_split) by generation."""
    kind = ""
    try:
        kind = jax.devices()[0].device_kind.lower()
    except Exception:
        pass
    if "v7" in kind:                                  # 64 MiB VMEM, 2 TCs/chip
        return 48 * 1024 * 1024, 40 * 1024 * 1024, True
    if "v2" in kind or "v3" in kind:                  # 16 MiB VMEM
        return 14 * 1024 * 1024, 10 * 1024 * 1024, False
    if any(g in kind for g in ("v4", "v5", "v6")):    # 128 MiB VMEM
        return 100 * 1024 * 1024, 88 * 1024 * 1024, False
    return 48 * 1024 * 1024, 40 * 1024 * 1024, False  # unknown -> conservative


def _pick_tile_b(B, D, v_t, v_s, t_itemsize, s_itemsize, budget_bytes,
                 prefer_split):
    """Largest legal batch tile whose double-buffered inputs/outputs plus live
    f32 intermediates fit the per-generation VMEM budget."""
    granule = 8 if min(t_itemsize, s_itemsize) >= 4 else 16   # bf16 -> 16 rows
    per_row = (2 * v_t * D * t_itemsize        # teacher views, double-buffered
               + 2 * v_s * D * s_itemsize      # student views, double-buffered
               + 2 * D * 4                      # center input, double-buffered
               + 2 * D * 4                      # center output, double-buffered
               + (v_t + 5) * D * 4)             # live f32 intermediates
    cap_rows = max(1, budget_bytes // per_row)
    cands = [t for t in range(granule, B + 1, granule) if B % t == 0]
    if B not in cands:
        cands.append(B)                         # full extent is always legal
    cands.sort()
    fitting = [t for t in cands if t <= cap_rows]
    tile = fitting[-1] if fitting else cands[0]
    if prefer_split and tile == B and (B // 2) in cands:
        tile = B // 2                           # >=2 grid steps for 2 TCs (v7x)
    return tile


def dino_loss_pallas(student_output, teacher_output, center, epoch, *,
                     teacher_temp_schedule, student_temp=0.1,
                     center_momentum=0.9, tile_b=None):
    """Returns (total_loss, new_center) mirroring DINOLoss_new.forward +
    update_center (the stateful center update is returned as a new array)."""
    v_s, B, D = student_output.shape
    v_t, Bt, Dt = teacher_output.shape
    assert (Bt, Dt) == (B, D)
    assert B % 8 == 0, "batch must be a multiple of 8"
    assert D % 128 == 0, "feature dim must be lane-aligned (multiple of 128)"
    temp = float(teacher_temp_schedule[epoch])

    # Normalize center (module inits it to scalar 0) to a materialized (B, D).
    center_arr = jnp.asarray(center, jnp.float32)
    if center_arr.ndim == 3:
        center_arr = center_arr[0]
    center_arr = jnp.zeros((B, D), jnp.float32) + center_arr

    limit_bytes, budget_bytes, prefer_split = _vmem_plan()
    if tile_b is None:
        tile_b = _pick_tile_b(B, D, v_t, v_s,
                              np.dtype(teacher_output.dtype).itemsize,
                              np.dtype(student_output.dtype).itemsize,
                              budget_bytes, prefer_split)
    assert tile_b % 8 == 0 and B % tile_b == 0
    n_tiles = B // tile_b
    n_loss_terms = v_t * v_s - min(v_t, v_s)
    assert n_loss_terms > 0

    kernel = _make_dino_kernel(v_t, v_s, float(student_temp), temp,
                               float(center_momentum))

    loss_partials, new_center = pl.pallas_call(
        kernel,
        out_shape=(jax.ShapeDtypeStruct((n_tiles * 8, D), jnp.float32),
                   jax.ShapeDtypeStruct((B, D), jnp.float32)),
        grid_spec=pltpu.PrefetchScalarGridSpec(
            num_scalar_prefetch=0,
            grid=(n_tiles,),
            in_specs=[
                # all teacher views for this batch tile (DMA'd once)
                pl.BlockSpec((v_t, tile_b, D), lambda b: (0, b, 0)),
                # all student views for this batch tile (DMA'd once)
                pl.BlockSpec((v_s, tile_b, D), lambda b: (0, b, 0)),
                # center slice for this batch tile
                pl.BlockSpec((tile_b, D), lambda b: (b, 0)),
            ],
            out_specs=[
                # full-vreg lane-dense per-tile loss partial (unmasked vst)
                pl.BlockSpec((8, D), lambda b: (b, 0)),
                # updated center slice (disjoint per grid step)
                pl.BlockSpec((tile_b, D), lambda b: (b, 0)),
            ],
        ),
        # Reuse the center input buffer for the updated center output.
        input_output_aliases={2: 1},
        compiler_params=pltpu.CompilerParams(
            # Every grid step handles a disjoint batch tile -> shardable across
            # TensorCores; no cross-step accumulators.
            dimension_semantics=("parallel",),
            vmem_limit_bytes=limit_bytes,
        ),
    )(teacher_output, student_output, center_arr)

    total_loss = jnp.sum(loss_partials) * np.float32(1.0 / (B * n_loss_terms))
    return total_loss, new_center


def dino_loss_ref(student_output, teacher_output, center, epoch, *,
                  teacher_temp_schedule, student_temp=0.1, center_momentum=0.9):
    """Pure-JAX reference mirroring the PyTorch module exactly."""
    temp = teacher_temp_schedule[epoch]
    student_out = student_output / student_temp
    teacher_out = jax.nn.softmax((teacher_output - center) / temp, axis=-1)
    total_loss = 0.0
    n_loss_terms = 0
    for iq in range(teacher_out.shape[0]):
        for v in range(student_out.shape[0]):
            if v == iq:
                continue
            loss = jnp.sum(-teacher_out[iq]
                           * jax.nn.log_softmax(student_out[v], axis=-1),
                           axis=-1)
            total_loss += loss.mean()
            n_loss_terms += 1
    total_loss = total_loss / n_loss_terms
    batch_center = jnp.sum(teacher_output, axis=0) / teacher_output.shape[0]
    new_center = center * center_momentum + batch_center * (1 - center_momentum)
    return total_loss, new_center


if __name__ == "__main__":
    # Module hyperparameters (deterministic, in-script).
    warmup_teacher_temp = 0.04
    teacher_temp = 0.07
    warmup_teacher_temp_epochs = 5
    nepochs = 10
    student_temp = 0.1
    center_momentum = 0.9
    teacher_temp_schedule = np.concatenate(
        (np.linspace(warmup_teacher_temp, teacher_temp,
                     warmup_teacher_temp_epochs),
         np.ones(nepochs - warmup_teacher_temp_epochs) * teacher_temp))

    # Small shapes: 2 teacher views, 4 student views, batch 16, dim 256.
    V_T, V_S, B, D = 2, 4, 16, 256
    key = jax.random.PRNGKey(0)
    k1, k2 = jax.random.split(key)
    student = jax.random.normal(k1, (V_S, B, D), dtype=jnp.float32)
    teacher = jax.random.normal(k2, (V_T, B, D), dtype=jnp.float32)
    epoch = 3
    center0 = jnp.zeros((B, D), dtype=jnp.float32)  # module inits self.center=0

    kwargs = dict(teacher_temp_schedule=teacher_temp_schedule,
                  student_temp=student_temp, center_momentum=center_momentum)

    # --- f32 inputs -----------------------------------------------------------
    loss_ref_f32, center_ref_f32 = dino_loss_ref(student, teacher, center0,
                                                 epoch, **kwargs)
    loss, new_center = dino_loss_pallas(
        student, teacher, jnp.zeros((B, D), jnp.float32), epoch, **kwargs)
    jax.block_until_ready((loss, new_center))
    assert np.allclose(np.asarray(loss), np.asarray(loss_ref_f32),
                       rtol=2e-3, atol=1e-4), (loss, loss_ref_f32)
    assert np.allclose(np.asarray(new_center), np.asarray(center_ref_f32),
                       rtol=1e-5, atol=1e-6)

    # --- bf16 inputs (halved HBM traffic; in-kernel math stays f32) -----------
    student_bf = student.astype(jnp.bfloat16)
    teacher_bf = teacher.astype(jnp.bfloat16)
    loss_ref_bf, center_ref_bf = dino_loss_ref(
        student_bf.astype(jnp.float32), teacher_bf.astype(jnp.float32),
        center0, epoch, **kwargs)
    loss_bf, center_bf = dino_loss_pallas(
        student_bf, teacher_bf, jnp.zeros((B, D), jnp.float32), epoch, **kwargs)
    jax.block_until_ready((loss_bf, center_bf))
    assert np.allclose(np.asarray(loss_bf), np.asarray(loss_ref_bf),
                       rtol=2e-3, atol=1e-4), (loss_bf, loss_ref_bf)
    assert np.allclose(np.asarray(center_bf), np.asarray(center_ref_bf),
                       rtol=1e-4, atol=1e-5)

    print("KERNEL_OK")
</pallas_src>

<mosaic_0001>
module attributes {stable_mosaic.version = 11 : i64} {
  func.func @kernel(%arg0: i32, %arg1: memref<2x16x256xf32, #tpu.memory_space<vmem>>, %arg2: memref<4x16x256xf32, #tpu.memory_space<vmem>>, %arg3: memref<16x256xf32, #tpu.memory_space<vmem>>, %arg4: memref<8x256xf32, #tpu.memory_space<vmem>>, %arg5: memref<16x256xf32, #tpu.memory_space<vmem>>) attributes {dimension_semantics = [#tpu.dimension_semantics<parallel>], iteration_bounds = array<i64: 1>, scalar_prefetch = 0 : i64, scratch_operands = 0 : i64, tpu.core_type = #tpu.core_type<tc>, window_params = [{transform_indices = @transform_0, window_bounds = array<i64: 2, 16, 256>}, {transform_indices = @transform_1, window_bounds = array<i64: 4, 16, 256>}, {transform_indices = @transform_2, window_bounds = array<i64: 16, 256>}, {transform_indices = @transform_3, window_bounds = array<i64: 8, 256>}, {transform_indices = @transform_4, window_bounds = array<i64: 16, 256>}]} {
    %c0 = arith.constant 0 : index
    %c0_0 = arith.constant 0 : index
    %0 = vector.load %arg3[%c0, %c0_0] : memref<16x256xf32, #tpu.memory_space<vmem>>, vector<16x256xf32>
    %c0_1 = arith.constant 0 : index
    %c0_2 = arith.constant 0 : index
    %c0_3 = arith.constant 0 : index
    %1 = vector.load %arg1[%c0_1, %c0_2, %c0_3] : memref<2x16x256xf32, #tpu.memory_space<vmem>>, vector<1x16x256xf32>
    %2 = vector.shape_cast %1 : vector<1x16x256xf32> to vector<16x256xf32>
    %3 = arith.subf %2, %0 : vector<16x256xf32>
    %cst = arith.constant 1.600000e+01 : f32
    %4 = vector.broadcast %cst : f32 to vector<16x256xf32>
    %5 = arith.mulf %3, %4 : vector<16x256xf32>
    %cst_4 = arith.constant dense<0xFF800000> : vector<16xf32>
    %6 = vector.multi_reduction <maximumf>, %5, %cst_4 [1] : vector<16x256xf32> to vector<16xf32>
    %7 = vector.shape_cast %6 : vector<16xf32> to vector<16x1xf32>
    %8 = vector.broadcast %7 : vector<16x1xf32> to vector<16x256xf32>
    %9 = arith.subf %5, %8 : vector<16x256xf32>
    %10 = math.exp %9 : vector<16x256xf32>
    %cst_5 = arith.constant dense<0.000000e+00> : vector<16xf32>
    %11 = vector.multi_reduction <add>, %10, %cst_5 [1] : vector<16x256xf32> to vector<16xf32>
    %12 = vector.shape_cast %11 : vector<16xf32> to vector<16x1xf32>
    %13 = tpu.reciprocal %12 {approx = true} : vector<16x1xf32> -> vector<16x1xf32>
    %14 = vector.broadcast %13 : vector<16x1xf32> to vector<16x256xf32>
    %15 = arith.mulf %10, %14 : vector<16x256xf32>
    %c1 = arith.constant 1 : index
    %c0_6 = arith.constant 0 : index
    %c0_7 = arith.constant 0 : index
    %16 = vector.load %arg1[%c1, %c0_6, %c0_7] : memref<2x16x256xf32, #tpu.memory_space<vmem>>, vector<1x16x256xf32>
    %17 = vector.shape_cast %16 : vector<1x16x256xf32> to vector<16x256xf32>
    %18 = arith.addf %2, %17 : vector<16x256xf32>
    %19 = arith.subf %17, %0 : vector<16x256xf32>
    %cst_8 = arith.constant 1.600000e+01 : f32
    %20 = vector.broadcast %cst_8 : f32 to vector<16x256xf32>
    %21 = arith.mulf %19, %20 : vector<16x256xf32>
    %cst_9 = arith.constant dense<0xFF800000> : vector<16xf32>
    %22 = vector.multi_reduction <maximumf>, %21, %cst_9 [1] : vector<16x256xf32> to vector<16xf32>
    %23 = vector.shape_cast %22 : vector<16xf32> to vector<16x1xf32>
    %24 = vector.broadcast %23 : vector<16x1xf32> to vector<16x256xf32>
    %25 = arith.subf %21, %24 : vector<16x256xf32>
    %26 = math.exp %25 : vector<16x256xf32>
    %cst_10 = arith.constant dense<0.000000e+00> : vector<16xf32>
    %27 = vector.multi_reduction <add>, %26, %cst_10 [1] : vector<16x256xf32> to vector<16xf32>
    %28 = vector.shape_cast %27 : vector<16xf32> to vector<16x1xf32>
    %29 = tpu.reciprocal %28 {approx = true} : vector<16x1xf32> -> vector<16x1xf32>
    %30 = vector.broadcast %29 : vector<16x1xf32> to vector<16x256xf32>
    %31 = arith.mulf %26, %30 : vector<16x256xf32>
    %32 = arith.addf %15, %31 : vector<16x256xf32>
    %cst_11 = arith.constant 0.000000e+00 : f32
    %33 = vector.broadcast %cst_11 : f32 to vector<16x256xf32>
    %c0_12 = arith.constant 0 : index
    %c0_13 = arith.constant 0 : index
    %c0_14 = arith.constant 0 : index
    %34 = vector.load %arg2[%c0_12, %c0_13, %c0_14] : memref<4x16x256xf32, #tpu.memory_space<vmem>>, vector<1x16x256xf32>
    %35 = vector.shape_cast %34 : vector<1x16x256xf32> to vector<16x256xf32>
    %cst_15 = arith.constant 1.000000e+01 : f32
    %36 = vector.broadcast %cst_15 : f32 to vector<16x256xf32>
    %37 = arith.mulf %35, %36 : vector<16x256xf32>
    %cst_16 = arith.constant dense<0xFF800000> : vector<16xf32>
    %38 = vector.multi_reduction <maximumf>, %37, %cst_16 [1] : vector<16x256xf32> to vector<16xf32>
    %39 = vector.shape_cast %38 : vector<16xf32> to vector<16x1xf32>
    %40 = vector.broadcast %39 : vector<16x1xf32> to vector<16x256xf32>
    %41 = arith.subf %37, %40 : vector<16x256xf32>
    %42 = math.exp %41 : vector<16x256xf32>
    %cst_17 = arith.constant dense<0.000000e+00> : vector<16xf32>
    %43 = vector.multi_reduction <add>, %42, %cst_17 [1] : vector<16x256xf32> to vector<16xf32>
    %44 = vector.shape_cast %43 : vector<16xf32> to vector<16x1xf32>
    %45 = math.log %44 : vector<16x1xf32>
    %46 = vector.broadcast %45 : vector<16x1xf32> to vector<16x256xf32>
    %47 = arith.subf %41, %46 : vector<16x256xf32>
    %48 = arith.subf %32, %15 : vector<16x256xf32>
    %49 = arith.mulf %48, %47 : vector<16x256xf32>
    %50 = arith.subf %33, %49 : vector<16x256xf32>
    %c1_18 = arith.constant 1 : index
    %c0_19 = arith.constant 0 : index
    %c0_20 = arith.constant 0 : index
    %51 = vector.load %arg2[%c1_18, %c0_19, %c0_20] : memref<4x16x256xf32, #tpu.memory_space<vmem>>, vector<1x16x256xf32>
    %52 = vector.shape_cast %51 : vector<1x16x256xf32> to vector<16x256xf32>
    %cst_21 = arith.constant 1.000000e+01 : f32
    %53 = vector.broadcast %cst_21 : f32 to vector<16x256xf32>
    %54 = arith.mulf %52, %53 : vector<16x256xf32>
    %cst_22 = arith.constant dense<0xFF800000> : vector<16xf32>
    %55 = vector.multi_reduction <maximumf>, %54, %cst_22 [1] : vector<16x256xf32> to vector<16xf32>
    %56 = vector.shape_cast %55 : vector<16xf32> to vector<16x1xf32>
    %57 = vector.broadcast %56 : vector<16x1xf32> to vector<16x256xf32>
    %58 = arith.subf %54, %57 : vector<16x256xf32>
    %59 = math.exp %58 : vector<16x256xf32>
    %cst_23 = arith.constant dense<0.000000e+00> : vector<16xf32>
    %60 = vector.multi_reduction <add>, %59, %cst_23 [1] : vector<16x256xf32> to vector<16xf32>
    %61 = vector.shape_cast %60 : vector<16xf32> to vector<16x1xf32>
    %62 = math.log %61 : vector<16x1xf32>
    %63 = vector.broadcast %62 : vector<16x1xf32> to vector<16x256xf32>
    %64 = arith.subf %58, %63 : vector<16x256xf32>
    %65 = arith.subf %32, %31 : vector<16x256xf32>
    %66 = arith.mulf %65, %64 : vector<16x256xf32>
    %67 = arith.subf %50, %66 : vector<16x256xf32>
    %c2 = arith.constant 2 : index
    %c0_24 = arith.constant 0 : index
    %c0_25 = arith.constant 0 : index
    %68 = vector.load %arg2[%c2, %c0_24, %c0_25] : memref<4x16x256xf32, #tpu.memory_space<vmem>>, vector<1x16x256xf32>
    %69 = vector.shape_cast %68 : vector<1x16x256xf32> to vector<16x256xf32>
    %cst_26 = arith.constant 1.000000e+01 : f32
    %70 = vector.broadcast %cst_26 : f32 to vector<16x256xf32>
    %71 = arith.mulf %69, %70 : vector<16x256xf32>
    %cst_27 = arith.constant dense<0xFF800000> : vector<16xf32>
    %72 = vector.multi_reduction <maximumf>, %71, %cst_27 [1] : vector<16x256xf32> to vector<16xf32>
    %73 = vector.shape_cast %72 : vector<16xf32> to vector<16x1xf32>
    %74 = vector.broadcast %73 : vector<16x1xf32> to vector<16x256xf32>
    %75 = arith.subf %71, %74 : vector<16x256xf32>
    %76 = math.exp %75 : vector<16x256xf32>
    %cst_28 = arith.constant dense<0.000000e+00> : vector<16xf32>
    %77 = vector.multi_reduction <add>, %76, %cst_28 [1] : vector<16x256xf32> to vector<16xf32>
    %78 = vector.shape_cast %77 : vector<16xf32> to vector<16x1xf32>
    %79 = math.log %78 : vector<16x1xf32>
    %80 = vector.broadcast %79 : vector<16x1xf32> to vector<16x256xf32>
    %81 = arith.subf %75, %80 : vector<16x256xf32>
    %82 = arith.mulf %32, %81 : vector<16x256xf32>
    %83 = arith.subf %67, %82 : vector<16x256xf32>
    %c3 = arith.constant 3 : index
    %c0_29 = arith.constant 0 : index
    %c0_30 = arith.constant 0 : index
    %84 = vector.load %arg2[%c3, %c0_29, %c0_30] : memref<4x16x256xf32, #tpu.memory_space<vmem>>, vector<1x16x256xf32>
    %85 = vector.shape_cast %84 : vector<1x16x256xf32> to vector<16x256xf32>
    %cst_31 = arith.constant 1.000000e+01 : f32
    %86 = vector.broadcast %cst_31 : f32 to vector<16x256xf32>
    %87 = arith.mulf %85, %86 : vector<16x256xf32>
    %cst_32 = arith.constant dense<0xFF800000> : vector<16xf32>
    %88 = vector.multi_reduction <maximumf>, %87, %cst_32 [1] : vector<16x256xf32> to vector<16xf32>
    %89 = vector.shape_cast %88 : vector<16xf32> to vector<16x1xf32>
    %90 = vector.broadcast %89 : vector<16x1xf32> to vector<16x256xf32>
    %91 = arith.subf %87, %90 : vector<16x256xf32>
    %92 = math.exp %91 : vector<16x256xf32>
    %cst_33 = arith.constant dense<0.000000e+00> : vector<16xf32>
    %93 = vector.multi_reduction <add>, %92, %cst_33 [1] : vector<16x256xf32> to vector<16xf32>
    %94 = vector.shape_cast %93 : vector<16xf32> to vector<16x1xf32>
    %95 = math.log %94 : vector<16x1xf32>
    %96 = vector.broadcast %95 : vector<16x1xf32> to vector<16x256xf32>
    %97 = arith.subf %91, %96 : vector<16x256xf32>
    %98 = arith.mulf %32, %97 : vector<16x256xf32>
    %99 = arith.subf %83, %98 : vector<16x256xf32>
    %100 = vector.extract_strided_slice %99 {offsets = [0, 0], sizes = [8, 256], strides = [1, 1]} : vector<16x256xf32> to vector<8x256xf32>
    %101 = vector.extract_strided_slice %99 {offsets = [8, 0], sizes = [8, 256], strides = [1, 1]} : vector<16x256xf32> to vector<8x256xf32>
    %102 = arith.addf %100, %101 : vector<8x256xf32>
    %c0_34 = arith.constant 0 : index
    %c0_35 = arith.constant 0 : index
    %103 = vector.load %arg4[%c0_34, %c0_35] : memref<8x256xf32, #tpu.memory_space<vmem>>, vector<8x256xf32>
    tpu.vector_store %arg4[%c0_34, %c0_35], %102 {strides = array<i32>} : memref<8x256xf32, #tpu.memory_space<vmem>>, vector<8x256xf32>,
    %cst_36 = arith.constant 0.899999976 : f32
    %104 = vector.broadcast %cst_36 : f32 to vector<16x256xf32>
    %105 = arith.mulf %0, %104 : vector<16x256xf32>
    %cst_37 = arith.constant 5.000000e-01 : f32
    %106 = vector.broadcast %cst_37 : f32 to vector<16x256xf32>
    %107 = arith.mulf %18, %106 : vector<16x256xf32>
    %cst_38 = arith.constant 1.000000e-01 : f32
    %108 = vector.broadcast %cst_38 : f32 to vector<16x256xf32>
    %109 = arith.mulf %107, %108 : vector<16x256xf32>
    %110 = arith.addf %105, %109 : vector<16x256xf32>
    %c0_39 = arith.constant 0 : index
    %c0_40 = arith.constant 0 : index
    %111 = vector.load %arg5[%c0_39, %c0_40] : memref<16x256xf32, #tpu.memory_space<vmem>>, vector<16x256xf32>
    tpu.vector_store %arg5[%c0_39, %c0_40], %110 {strides = array<i32>} : memref<16x256xf32, #tpu.memory_space<vmem>>, vector<16x256xf32>,
    return
  }
  func.func @transform_0(%arg0: i32) -> (i32, i32, i32) {
    %c0_i32 = arith.constant 0 : i32
    %c0_i32_0 = arith.constant 0 : i32
    %c0_i32_1 = arith.constant 0 : i32
    return %c0_i32, %arg0, %c0_i32_0 : i32, i32, i32
  }
  func.func @transform_1(%arg0: i32) -> (i32, i32, i32) {
    %c0_i32 = arith.constant 0 : i32
    %c0_i32_0 = arith.constant 0 : i32
    %c0_i32_1 = arith.constant 0 : i32
    return %c0_i32, %arg0, %c0_i32_0 : i32, i32, i32
  }
  func.func @transform_2(%arg0: i32) -> (i32, i32) {
    %c0_i32 = arith.constant 0 : i32
    %c0_i32_0 = arith.constant 0 : i32
    return %arg0, %c0_i32 : i32, i32
  }
  func.func @transform_3(%arg0: i32) -> (i32, i32) {
    %c0_i32 = arith.constant 0 : i32
    %c0_i32_0 = arith.constant 0 : i32
    return %arg0, %c0_i32 : i32, i32
  }
  func.func @transform_4(%arg0: i32) -> (i32, i32) {
    %c0_i32 = arith.constant 0 : i32
    %c0_i32_0 = arith.constant 0 : i32
    return %arg0, %c0_i32 : i32, i32
  }
}

</mosaic_0001>

<bundles_post_ra>
// kernel: tpu_custom_call.1
= control target key start
LH: loop header
LB: loop body
LE: loop exit
PB: predicated region body
PF: predicated region fallthrough
CT: control target
= control target key end

     0   :  { %10 = vsyncpa [#allocation3], 0  ;;  %s876_s0 = inlined_call_operand.vmem [shape: f32[2,16,256], index: 0, kind: input, shape index: {}]   ;;  %s877_s1 = inlined_call_operand.hbm [shape: f32[4,16,256], index: 1, kind: input, shape index: {}]   ;;  %s878_s2 = inlined_call_operand.hbm [shape: f32[16,256], index: 2, kind: input, shape index: {}, may-alias: {2,4}]   ;;  %s879_s3 = inlined_call_operand.hbm [shape: f32[8,256], index: 3, kind: output, shape index: {0}]   ;;  %s880_s4 = inlined_call_operand.hbm [shape: f32[16,256], index: 4, kind: output, shape index: {1}, may-alias: {2,4}]  }
   0x1   :  { %11 = vsyncpa [#allocation6], 0 }
   0x2   :  { %12 = vsyncpa [#allocation4], 0 }
   0x3   :  { %13 = vsyncpa [#allocation9], 0  ;;  %s20_s17 = sshll.u32 %s877_s1, 4  ;;  %s596_s18 = smov [#allocation2]   ;;  %s21_s17 = int_to_ptr.hbm [resolvable:$true] %s20_s17 }
   0x4   :  { %s22_s19 = sshll.u32 %s596_s18, 4  ;;  %s33_s22 = sshll.u32 %s878_s2, 4  ;;  %s23_s19 = int_to_ptr.vmem [resolvable:$true] %s22_s19  ;;  %s34_s22 = int_to_ptr.hbm [resolvable:$true] %s33_s22 }
   0x5   :  { %s597_s23 = smov 256   ;;  %s598_s24 = smov 16  }
   0x6   :  { %28 = dma.hbm_to_vmem [thread:$0]  %s21_s17, 2048, %s23_s19, [#allocation3], %s597_s23, %s597_s23, %s598_s24  }
   0x7   :  { %s599_s25 = smov [#allocation5]  }
   0x8   :  { %s35_s26 = sshll.u32 %s599_s25, 4  ;;  %s36_s26 = int_to_ptr.vmem [resolvable:$true] %s35_s26 }
   0x9   :  { %41 = dma.hbm_to_vmem [thread:$0]  %s34_s22, 512, %s36_s26, [#allocation6], %s597_s23, %s597_s23, %s598_s24  }
   0xa   :  { %588 = dma.done.wait [#allocation3], 2048  }
   0xb   :  { %589 = vsyncadd [#allocation3], 4294965248 }
   0xc   :  { %590 = dma.done.wait [#allocation6], 512  }
   0xd   :  { %591 = vsyncadd [#allocation6], 4294966784  ;;  %v147_v0 = vld [vmem:[#allocation2] sm:$0xff]  ;;  %v148_v1 = vld [vmem:[#allocation2 + $0x8] sm:$0xff]  ;;  %s391_s18 = sshll.u32 %s880_s4, 4  ;;  %s601_s4 = smov [#allocation7]   ;;  %s392_s18 = int_to_ptr.hbm [resolvable:$true] %s391_s18 }
   0xe   :  { %v50_v2 = vld [vmem:[#allocation5] sm:$0xff]  ;;  %v639_v3 = vmul.f32 10.0, %v147_v0  ;;  %v641_v4 = vmul.f32 10.0, %v148_v1  ;;  %v51_v5 = vld [vmem:[#allocation5 + $0x8] sm:$0xff]  ;;  %v149_v18 = vld [vmem:[#allocation2 + $0x10] sm:$0xff]  ;;  %s379_s19 = sshll.u32 %s601_s4, 4  ;;  %s380_s19 = int_to_ptr.vmem [resolvable:$true] %s379_s19 }
   0xf   :  { %v410_v6 = vld [vmem:[%s876_s0 + $0x20] sm:$0xff]  ;;  %v411_v7 = vld [vmem:[%s876_s0 + $0x28] sm:$0xff]  ;;  %v354_v10 = vmul.f32 0.9, %v50_v2  ;;  %v355_v11 = vmul.f32 0.9, %v51_v5 }
  0x10   :  { %v105_v8 = vsub.f32 %v410_v6, %v50_v2  ;;  %v106_v9 = vsub.f32 %v411_v7, %v51_v5  ;;  %v54_v12 = vld [vmem:[%s876_s0] sm:$0xff]  ;;  %v55_v13 = vld [vmem:[%s876_s0 + $0x8] sm:$0xff]  ;;  %v155_v14 = vmax.f32 %v639_v3, %v641_v4  ;;  %v150_v19 = vld [vmem:[#allocation2 + $0x18] sm:$0xff]  ;;  %v661_v24 = vmul.f32 10.0, %v149_v18  ;;  %s381_s22 = sshll.u32 %s879_s3, 4  ;;  %s382_s22 = int_to_ptr.hbm [resolvable:$true] %s381_s22 }
  0x11   :  { %v58_v15 = vsub.f32 %v54_v12, %v50_v2  ;;  %v59_v16 = vsub.f32 %v55_v13, %v51_v5  ;;  %v101_v17 = vadd.f32 %v410_v6, %v54_v12  ;;  %v52_v20 = vld [vmem:[#allocation5 + $0x10] sm:$0xff]  ;;  %v102_v23 = vadd.f32 %v411_v7, %v55_v13  ;;  %v53_v25 = vld [vmem:[#allocation5 + $0x18] sm:$0xff]  ;;  %v253_v50 = vld [vmem:[#allocation2 + $0x40] sm:$0xff] }
  0x12   :  { %v657_v21 = vmul.f32 16.0, %v105_v8  ;;  %v659_v22 = vmul.f32 16.0, %v106_v9  ;;  %v412_v26 = vld [vmem:[%s876_s0 + $0x30] sm:$0xff]  ;;  %v413_v27 = vld [vmem:[%s876_s0 + $0x38] sm:$0xff]  ;;  %156 = vmax.xlane.f32.xlu2 %v155_v14  ;;  %v673_v31 = vmul.f32 10.0, %v150_v19  ;;  %v254_v51 = vld [vmem:[#allocation2 + $0x48] sm:$0xff] }
  0x13   :  { %v669_v28 = vmul.f32 16.0, %v58_v15  ;;  %v671_v29 = vmul.f32 16.0, %v59_v16  ;;  %v358_v30 = vmul.f32 0.5, %v101_v17  ;;  %v359_v33 = vmul.f32 0.5, %v102_v23  ;;  %v56_v36 = vld [vmem:[%s876_s0 + $0x10] sm:$0xff]  ;;  %v57_v37 = vld [vmem:[%s876_s0 + $0x18] sm:$0xff] }
  0x14   :  { %v113_v32 = vmax.f32 %v657_v21, %v659_v22  ;;  %v107_v34 = vsub.f32 %v412_v26, %v52_v20  ;;  %v108_v35 = vsub.f32 %v413_v27, %v53_v25  ;;  %v158_v41 = vmax.f32 %v661_v24, %v673_v31  ;;  %v202_v63 = vld [vmem:[#allocation2 + $0x30] sm:$0xff]  ;;  %v203_v0 = vld [vmem:[#allocation2 + $0x38] sm:$0xff]  ;;  %v200_v2 = vld [vmem:[#allocation2 + $0x20] sm:$0xff]  ;;  %s600_s0 = smov [#allocation8]  }
  0x15   :  { %v66_v38 = vmax.f32 %v669_v28, %v671_v29  ;;  %v362_v39 = vmul.f32 0.1, %v358_v30  ;;  %v363_v40 = vmul.f32 0.1, %v359_v33  ;;  %v60_v45 = vsub.f32 %v56_v36, %v52_v20  ;;  %v201_v5 = vld [vmem:[#allocation2 + $0x28] sm:$0xff]  ;;  %v304_v13 = vld [vmem:[#allocation2 + $0x70] sm:$0xff] }
  0x16   :  { %114 = vmax.xlane.f32.xlu1 %v113_v32  ;;  %v687_v42 = vmul.f32 16.0, %v107_v34  ;;  %v689_v43 = vmul.f32 16.0, %v108_v35  ;;  %v61_v46 = vsub.f32 %v57_v37, %v53_v25  ;;  %v103_v47 = vadd.f32 %v412_v26, %v56_v36  ;;  %v305_v14 = vld [vmem:[#allocation2 + $0x78] sm:$0xff]  ;;  %v302_v19 = vld [vmem:[#allocation2 + $0x60] sm:$0xff]  ;;  %v255_v23 = vld [vmem:[#allocation2 + $0x50] sm:$0xff]  ;;  %s389_s15 = sshll.u32 %s600_s0, 4  ;;  %s390_s15 = int_to_ptr.vmem [resolvable:$true] %s389_s15 }
  0x17   :  { %v366_v44 = vadd.f32 %v362_v39, %v354_v10  ;;  %67 = vmax.xlane.f32.xlu0 %v66_v38  ;;  %v367_v48 = vadd.f32 %v363_v40, %v355_v11  ;;  %v104_v49 = vadd.f32 %v413_v27, %v57_v37  ;;  %v356_v52 = vmul.f32 0.9, %v52_v20  ;;  %v303_v20 = vld [vmem:[#allocation2 + $0x68] sm:$0xff] }
  0x18   :  { %v691_v53 = vmul.f32 16.0, %v60_v45  ;;  %v693_v54 = vmul.f32 16.0, %v61_v46  ;;  %v360_v55 = vmul.f32 0.5, %v103_v47  ;;  %v116_v56 = vmax.f32 %v687_v42, %v689_v43 }
  0x19   :  { %370 = vst [vmem:[#allocation8] sm:$0xff] %v366_v44  ;;  %v357_v57 = vmul.f32 0.9, %v53_v25  ;;  %v361_v58 = vmul.f32 0.5, %v104_v49  ;;  %v699_v61 = vmul.f32 10.0, %v253_v50  ;;  %v701_v62 = vmul.f32 10.0, %v254_v51 }
  0x1a   :  { %371 = vst [vmem:[#allocation8 + $0x8] sm:$0xff] %v367_v48  ;;  %159 = vmax.xlane.f32.xlu2 %v158_v41  ;;  %v69_v59 = vmax.f32 %v691_v53, %v693_v54  ;;  %v364_v60 = vmul.f32 0.1, %v360_v55  ;;  %v703_v8 = vmul.f32 10.0, %v202_v63  ;;  %v705_v9 = vmul.f32 10.0, %v203_v0  ;;  %v256_v25 = vld [vmem:[#allocation2 + $0x58] sm:$0xff] }
  0x1b   :  { %v365_v1 = vmul.f32 0.1, %v361_v58  ;;  %v261_v10 = vmax.f32 %v699_v61, %v701_v62  ;;  %v709_v11 = vmul.f32 10.0, %v200_v2  ;;  %v711_v12 = vmul.f32 10.0, %v201_v5 }
  0x1c   :  { %v368_v6 = vadd.f32 %v364_v60, %v356_v52  ;;  %v211_v15 = vmax.f32 %v703_v8, %v705_v9  ;;  %v717_v17 = vmul.f32 10.0, %v304_v13  ;;  %v719_v18 = vmul.f32 10.0, %v305_v14 }
  0x1d   :  { %v369_v7 = vadd.f32 %v365_v1, %v357_v57  ;;  %v208_v16 = vmax.f32 %v709_v11, %v711_v12  ;;  %v721_v26 = vmul.f32 10.0, %v302_v19  ;;  %v723_v27 = vmul.f32 10.0, %v303_v20 }
  0x1e   :  { %117 = vmax.xlane.f32.xlu1 %v116_v56  ;;  %372 = vst [vmem:[#allocation8 + $0x10] sm:$0xff] %v368_v6  ;;  %v313_v30 = vmax.f32 %v717_v17, %v719_v18  ;;  %v727_v32 = vmul.f32 10.0, %v255_v23  ;;  %v729_v33 = vmul.f32 10.0, %v256_v25 }
  0x1f   :  { %70 = vmax.xlane.f32.xlu0 %v69_v59  ;;  %373 = vst [vmem:[#allocation8 + $0x18] sm:$0xff] %v369_v7  ;;  %v310_v34 = vmax.f32 %v721_v26, %v723_v27 }
  0x20   :  { %v264_v35 = vmax.f32 %v727_v32, %v729_v33  ;;  %397 = dma.vmem_to_hbm [thread:$0]  %s390_s15, 512, %s392_s18, [#allocation9], %s597_s23, %s597_s23, %s598_s24  }
  0x22   :  { %262 = vmax.xlane.f32.xlu2 %v261_v10 }
  0x26   :  { %212 = vmax.xlane.f32.xlu1 %v211_v15 }
  0x27   :  { %209 = vmax.xlane.f32.xlu0 %v208_v16 }
  0x2a   :  { %314 = vmax.xlane.f32.xlu2 %v313_v30 }
  0x2e   :  { %311 = vmax.xlane.f32.xlu1 %v310_v34 }
  0x2f   :  { %265 = vmax.xlane.f32.xlu0 %v264_v35 }
  0x85   :  { %v157_v36 = vpop.xlane.xlu2 %156 }
  0x86   :  { %v736_v37 = vsub.f32 %v639_v3, %v157_v36  ;;  %v739_v38 = vsub.f32 %v641_v4, %v157_v36 }
  0x88   :  { %v165_v39 = vmul.f32 1.442695, %v736_v37  ;;  %v167_v40 = vmul.f32 1.442695, %v739_v38 }
  0x89   :  { %v115_v41 = vpop.xlane.xlu1 %114 }
  0x8a   :  { %v68_v44 = vpop.xlane.xlu0 %67  ;;  %420 = vpow2.f32 %v165_v39  ;;  %v119_v55 = vsub.f32 %v657_v21, %v115_v41  ;;  %v120_v1 = vsub.f32 %v659_v22, %v115_v41 }
  0x8b   :  { %422 = vpow2.f32 %v167_v40  ;;  %v72_v21 = vsub.f32 %v669_v28, %v68_v44 }
  0x8c   :  { %v123_v58 = vmul.f32 1.442695, %v119_v55 }
  0x8d   :  { %v160_v45 = vpop.xlane.xlu2 %159  ;;  %v76_v15 = vmul.f32 1.442695, %v72_v21 }
  0x8e   :  { %v744_v46 = vsub.f32 %v661_v24, %v160_v45  ;;  %v747_v47 = vsub.f32 %v673_v31, %v160_v45 }
  0x90   :  { %v421_v3 = vpop.eup %420  ;;  %v169_v48 = vmul.f32 1.442695, %v744_v46  ;;  %v171_v4 = vmul.f32 1.442695, %v747_v47 }
  0x91   :  { %v751_v49 = vpop.xlane.xlu1 %117  ;;  %v423_v50 = vpop.eup %422 }
  0x92   :  { %v71_v51 = vpop.xlane.xlu0 %70  ;;  %424 = vpow2.f32 %v169_v48  ;;  %v173_v52 = vadd.f32 %v423_v50, %v421_v3 }
  0x93   :  { %426 = vpow2.f32 %v171_v4  ;;  %v74_v10 = vsub.f32 %v691_v53, %v71_v51 }
  0x94   :  { %174 = vadd.xlane.f32.xlu1 %v173_v52 }
  0x95   :  { %v263_v24 = vpop.xlane.xlu2 %262  ;;  %v80_v16 = vmul.f32 1.442695, %v74_v10 }
  0x96   :  { %v755_v56 = vsub.f32 %v699_v61, %v263_v24  ;;  %v758_v31 = vsub.f32 %v701_v62, %v263_v24 }
  0x98   :  { %v425_v57 = vpop.eup %424  ;;  %v271_v59 = vmul.f32 1.442695, %v755_v56  ;;  %v273_v60 = vmul.f32 1.442695, %v758_v31 }
  0x99   :  { %v213_v63 = vpop.xlane.xlu1 %212  ;;  %v427_v0 = vpop.eup %426 }
  0x9a   :  { %v765_v2 = vsub.f32 %v703_v8, %v213_v63  ;;  %v768_v61 = vsub.f32 %v705_v9, %v213_v63  ;;  %v210_v62 = vpop.xlane.xlu0 %209  ;;  %428 = vpow2.f32 %v271_v59  ;;  %v176_v7 = vadd.f32 %v427_v0, %v425_v57 }
  0x9b   :  { %v771_v5 = vsub.f32 %v709_v11, %v210_v62  ;;  %v774_v6 = vsub.f32 %v711_v12, %v210_v62  ;;  %430 = vpow2.f32 %v273_v60  ;;  %v75_v8 = vsub.f32 %v693_v54, %v71_v51 }
  0x9c   :  { %v222_v22 = vmul.f32 1.442695, %v765_v2  ;;  %v224_v28 = vmul.f32 1.442695, %v768_v61  ;;  %432 = vpow2.f32 %v123_v58  ;;  %177 = vadd.xlane.f32.xlu2 %v176_v7  ;;  %v125_v11 = vmul.f32 1.442695, %v120_v1 }
  0x9d   :  { %v218_v9 = vmul.f32 1.442695, %v771_v5  ;;  %v220_v13 = vmul.f32 1.442695, %v774_v6  ;;  %v73_v12 = vsub.f32 %v671_v29, %v68_v44  ;;  %v315_v14 = vpop.xlane.xlu2 %314  ;;  %v82_v20 = vmul.f32 1.442695, %v75_v8 }
  0x9e   :  { %434 = vpow2.f32 %v222_v22  ;;  %v784_v53 = vsub.f32 %v717_v17, %v315_v14  ;;  %v787_v19 = vsub.f32 %v719_v18, %v315_v14 }
  0x9f   :  { %436 = vpow2.f32 %v224_v28  ;;  %v78_v30 = vmul.f32 1.442695, %v73_v12 }
  0xa0   :  { %438 = vpow2.f32 %v218_v9  ;;  %v429_v54 = vpop.eup %428  ;;  %v324_v35 = vmul.f32 1.442695, %v784_v53  ;;  %v326_v39 = vmul.f32 1.442695, %v787_v19 }
  0xa1   :  { %440 = vpow2.f32 %v220_v13  ;;  %v312_v23 = vpop.xlane.xlu1 %311  ;;  %v431_v25 = vpop.eup %430 }
  0xa2   :  { %442 = vpow2.f32 %v125_v11  ;;  %v790_v29 = vsub.f32 %v721_v26, %v312_v23  ;;  %v792_v34 = vpop.eup %432  ;;  %v279_v17 = vadd.f32 %v431_v25, %v429_v54  ;;  %v796_v36 = vsub.f32 %v723_v27, %v312_v23  ;;  %v266_v52 = vpop.xlane.xlu0 %265 }
  0xa3   :  { %444 = vpow2.f32 %v76_v15  ;;  %v121_v26 = vsub.f32 %v687_v42, %v751_v49  ;;  %v122_v27 = vsub.f32 %v689_v43, %v751_v49  ;;  %v816_v58 = vsub.f32 %v727_v32, %v266_v52 }
  0xa4   :  { %v435_v18 = vpop.eup %434  ;;  %446 = vpow2.f32 %v80_v16  ;;  %280 = vadd.xlane.f32.xlu2 %v279_v17  ;;  %v320_v45 = vmul.f32 1.442695, %v790_v29  ;;  %v322_v48 = vmul.f32 1.442695, %v796_v36  ;;  %v819_v60 = vsub.f32 %v729_v33, %v266_v52 }
  0xa5   :  { %v437_v40 = vpop.eup %436  ;;  %448 = vpow2.f32 %v82_v20  ;;  %v127_v42 = vmul.f32 1.442695, %v121_v26  ;;  %v129_v57 = vmul.f32 1.442695, %v122_v27  ;;  %v275_v62 = vmul.f32 1.442695, %v816_v58 }
  0xa6   :  { %v439_v41 = vpop.eup %438  ;;  %450 = vpow2.f32 %v78_v30  ;;  %v229_v44 = vadd.f32 %v437_v40, %v435_v18  ;;  %v277_v32 = vmul.f32 1.442695, %v819_v60 }
  0xa7   :  { %v441_v3 = vpop.eup %440  ;;  %452 = vpow2.f32 %v324_v35 }
  0xa8   :  { %v805_v4 = vpop.eup %442  ;;  %454 = vpow2.f32 %v326_v39  ;;  %230 = vadd.xlane.f32.xlu1 %v229_v44  ;;  %v226_v50 = vadd.f32 %v441_v3, %v439_v41 }
  0xa9   :  { %v807_v51 = vpop.eup %444  ;;  %456 = vpow2.f32 %v320_v45  ;;  %v131_v43 = vadd.f32 %v805_v4, %v792_v34 }
  0xaa   :  { %v809_v55 = vpop.eup %446  ;;  %227 = vadd.xlane.f32.xlu0 %v226_v50  ;;  %458 = vpow2.f32 %v322_v48 }
  0xab   :  { %v811_v24 = vpop.eup %448  ;;  %460 = vpow2.f32 %v127_v42 }
  0xac   :  { %v451_v49 = vpop.eup %450  ;;  %132 = vadd.xlane.f32.xlu2 %v131_v43  ;;  %v87_v0 = vadd.f32 %v811_v24, %v809_v55  ;;  %462 = vpow2.f32 %v129_v57 }
  0xad   :  { %v453_v59 = vpop.eup %452  ;;  %v84_v21 = vadd.f32 %v451_v49, %v807_v51  ;;  %464 = vpow2.f32 %v275_v62 }
  0xae   :  { %v455_v63 = vpop.eup %454  ;;  %466 = vpow2.f32 %v277_v32 }
  0xaf   :  { %v457_v1 = vpop.eup %456  ;;  %v331_v10 = vadd.f32 %v455_v63, %v453_v59 }
  0xb0   :  { %88 = vadd.xlane.f32.xlu1 %v87_v0  ;;  %v459_v7 = vpop.eup %458 }
  0xb1   :  { %v826_v22 = vpop.eup %460  ;;  %v328_v33 = vadd.f32 %v459_v7, %v457_v1 }
  0xb2   :  { %85 = vadd.xlane.f32.xlu0 %v84_v21  ;;  %v828_v28 = vpop.eup %462 }
  0xb3   :  { %v134_v8 = vadd.f32 %v828_v28, %v826_v22  ;;  %v465_v9 = vpop.eup %464 }
  0xb4   :  { %332 = vadd.xlane.f32.xlu2 %v331_v10  ;;  %v467_v13 = vpop.eup %466 }
  0xb5   :  { %v282_v11 = vadd.f32 %v467_v13, %v465_v9 }
  0xb8   :  { %329 = vadd.xlane.f32.xlu1 %v328_v33 }
  0xba   :  { %135 = vadd.xlane.f32.xlu0 %v134_v8 }
  0xc2   :  { %283 = vadd.xlane.f32.xlu0 %v282_v11 }
 0x107   :  { %v175_v14 = vpop.xlane.xlu1 %174 }
 0x10f   :  { %v178_v12 = vpop.xlane.xlu2 %177 }
 0x117   :  { %v281_v15 = vpop.xlane.xlu2 %280 }
 0x11b   :  { %v231_v16 = vpop.xlane.xlu1 %230 }
 0x11d   :  { %v228_v54 = vpop.xlane.xlu0 %227 }
 0x11f   :  { %v133_v20 = vpop.xlane.xlu2 %132 }
 0x120   :  { %468 = vrcp.f32 %v133_v20 }
 0x121   :  { %470 = vlog2.f32 %v175_v14 }
 0x123   :  { %v89_v23 = vpop.xlane.xlu1 %88 }
 0x125   :  { %v86_v25 = vpop.xlane.xlu0 %85 }
 0x126   :  { %472 = vrcp.f32 %v86_v25  ;;  %v469_v30 = vpop.eup %468 }
 0x127   :  { %474 = vlog2.f32 %v178_v12  ;;  %v471_v17 = vpop.eup %470  ;;  %v139_v39 = vmul.f32 %v469_v30, %v792_v34  ;;  %v140_v40 = vmul.f32 %v469_v30, %v805_v4  ;;  %v333_v44 = vpop.xlane.xlu2 %332 }
 0x128   :  { %476 = vlog2.f32 %v281_v15  ;;  %v180_v27 = vmul.f32 0.6931472, %v471_v17 }
 0x129   :  { %478 = vlog2.f32 %v231_v16 }
 0x12a   :  { %480 = vlog2.f32 %v228_v54  ;;  %v183_v43 = vsub.f32 %v736_v37, %v180_v27 }
 0x12b   :  { %v330_v35 = vpop.xlane.xlu1 %329  ;;  %482 = vrcp.f32 %v89_v23 }
 0x12c   :  { %v473_v18 = vpop.eup %472  ;;  %484 = vlog2.f32 %v330_v35 }
 0x12d   :  { %v92_v41 = vmul.f32 %v473_v18, %v807_v51  ;;  %v93_v26 = vmul.f32 %v473_v18, %v451_v49  ;;  %v136_v45 = vpop.xlane.xlu0 %135  ;;  %v475_v3 = vpop.eup %474  ;;  %v184_v49 = vsub.f32 %v739_v38, %v180_v27 }
 0x12e   :  { %486 = vrcp.f32 %v136_v45  ;;  %v477_v48 = vpop.eup %476  ;;  %v182_v59 = vmul.f32 0.6931472, %v475_v3 }
 0x12f   :  { %v841_v50 = vadd.f32 %v139_v39, %v92_v41  ;;  %v843_v52 = vadd.f32 %v140_v40, %v93_v26  ;;  %v479_v42 = vpop.eup %478  ;;  %488 = vlog2.f32 %v333_v44  ;;  %v286_v0 = vmul.f32 0.6931472, %v477_v48 }
 0x130   :  { %v481_v34 = vpop.eup %480  ;;  %v235_v21 = vmul.f32 0.6931472, %v479_v42  ;;  %v185_v38 = vsub.f32 %v744_v46, %v182_v59  ;;  %v186_v14 = vsub.f32 %v747_v47, %v182_v59 }
 0x131   :  { %v187_v57 = vsub.f32 %v841_v50, %v92_v41  ;;  %v188_v4 = vsub.f32 %v843_v52, %v93_v26  ;;  %v483_v51 = vpop.eup %482  ;;  %v233_v62 = vmul.f32 0.6931472, %v481_v34  ;;  %v240_v11 = vsub.f32 %v841_v50, %v139_v39 }
 0x132   :  { %v485_v63 = vpop.eup %484  ;;  %v94_v10 = vmul.f32 %v483_v51, %v809_v55  ;;  %v95_v33 = vmul.f32 %v483_v51, %v811_v24  ;;  %v241_v12 = vsub.f32 %v843_v52, %v140_v40  ;;  %v289_v20 = vsub.f32 %v755_v56, %v286_v0 }
 0x133   :  { %v191_v7 = vmul.f32 %v187_v57, %v183_v43  ;;  %v192_v32 = vmul.f32 %v188_v4, %v184_v49  ;;  %v335_v15 = vmul.f32 0.6931472, %v485_v63  ;;  %v236_v24 = vsub.f32 %v771_v5, %v233_v62 }
 0x134   :  { %v487_v1 = vpop.eup %486  ;;  %v290_v46 = vsub.f32 %v758_v31, %v286_v0  ;;  %v238_v23 = vsub.f32 %v765_v2, %v235_v21  ;;  %v239_v31 = vsub.f32 %v768_v61, %v235_v21  ;;  %v293_v27 = vmul.f32 %v289_v20, %v841_v50 }
 0x135   :  { %v141_v8 = vmul.f32 %v487_v1, %v826_v22  ;;  %v142_v9 = vmul.f32 %v487_v1, %v828_v28  ;;  %v284_v13 = vpop.xlane.xlu0 %283  ;;  %v489_v37 = vpop.eup %488  ;;  %v237_v22 = vsub.f32 %v774_v6, %v233_v62  ;;  %v195_v54 = vsub.f32 0.0, %v191_v7 }
 0x136   :  { %490 = vlog2.f32 %v284_v13  ;;  %v196_v28 = vsub.f32 0.0, %v192_v32  ;;  %v337_v25 = vmul.f32 0.6931472, %v489_v37  ;;  %v244_v30 = vmul.f32 %v240_v11, %v236_v24 }
 0x137   :  { %v145_v16 = vadd.f32 %v141_v8, %v94_v10  ;;  %v146_v55 = vadd.f32 %v142_v9, %v95_v33  ;;  %v245_v17 = vmul.f32 %v241_v12, %v237_v22  ;;  %v338_v18 = vsub.f32 %v790_v29, %v335_v15 }
 0x138   :  { %v339_v39 = vsub.f32 %v796_v36, %v335_v15  ;;  %v248_v41 = vsub.f32 %v195_v54, %v244_v30  ;;  %v340_v2 = vsub.f32 %v784_v53, %v337_v25  ;;  %v341_v45 = vsub.f32 %v787_v19, %v337_v25 }
 0x139   :  { %v189_v35 = vsub.f32 %v145_v16, %v94_v10  ;;  %v190_v47 = vsub.f32 %v146_v55, %v95_v33  ;;  %v242_v5 = vsub.f32 %v145_v16, %v141_v8  ;;  %v243_v40 = vsub.f32 %v146_v55, %v142_v9 }
 0x13a   :  { %v249_v26 = vsub.f32 %v196_v28, %v245_v17  ;;  %v294_v29 = vmul.f32 %v290_v46, %v843_v52  ;;  %v297_v51 = vsub.f32 %v248_v41, %v293_v27  ;;  %v342_v61 = vmul.f32 %v338_v18, %v841_v50 }
 0x13b   :  { %v193_v44 = vmul.f32 %v189_v35, %v185_v38  ;;  %v194_v56 = vmul.f32 %v190_v47, %v186_v14  ;;  %v246_v42 = vmul.f32 %v242_v5, %v238_v23  ;;  %v247_v34 = vmul.f32 %v243_v40, %v239_v31 }
 0x13c   :  { %v491_v6 = vpop.eup %490  ;;  %v298_v43 = vsub.f32 %v249_v26, %v294_v29  ;;  %v343_v53 = vmul.f32 %v339_v39, %v843_v52  ;;  %v344_v0 = vmul.f32 %v340_v2, %v145_v16  ;;  %v345_v1 = vmul.f32 %v341_v45, %v146_v55 }
 0x13d   :  { %v288_v3 = vmul.f32 0.6931472, %v491_v6  ;;  %v197_v48 = vsub.f32 0.0, %v193_v44  ;;  %v198_v36 = vsub.f32 0.0, %v194_v56  ;;  %v346_v7 = vsub.f32 %v297_v51, %v342_v61 }
 0x13e   :  { %v347_v32 = vsub.f32 %v298_v43, %v343_v53 }
 0x13f   :  { %v291_v57 = vsub.f32 %v816_v58, %v288_v3  ;;  %v292_v4 = vsub.f32 %v819_v60, %v288_v3  ;;  %v250_v19 = vsub.f32 %v197_v48, %v246_v42  ;;  %v251_v49 = vsub.f32 %v198_v36, %v247_v34 }
 0x141   :  { %v295_v59 = vmul.f32 %v291_v57, %v145_v16  ;;  %v296_v63 = vmul.f32 %v292_v4, %v146_v55 }
 0x143   :  { %v299_v21 = vsub.f32 %v250_v19, %v295_v59  ;;  %v300_v62 = vsub.f32 %v251_v49, %v296_v63 }
 0x145   :  { %v348_v10 = vsub.f32 %v299_v21, %v344_v0  ;;  %v349_v58 = vsub.f32 %v300_v62, %v345_v1 }
 0x147   :  { %v350_v60 = vadd.f32 %v348_v10, %v346_v7  ;;  %v351_v50 = vadd.f32 %v349_v58, %v347_v32 }
 0x149   :  { %352 = vst [vmem:[#allocation7] sm:$0xff] %v350_v60 }
 0x14a   :  { %353 = vst [vmem:[#allocation7 + $0x8] sm:$0xff] %v351_v50 }
 0x14b   :  { %384 = dma.vmem_to_hbm [thread:$0]  %s380_s19, 256, %s382_s22, [#allocation4]  }
 0x14c   :  { %592 = dma.done.wait [#allocation4], 256  }
 0x14d   :  { %593 = vsyncadd [#allocation4], 4294967040 }
 0x14e   :  { %594 = dma.done.wait [#allocation9], 512  }
 0x14f   :  { %595 = vsyncadd [#allocation9], 4294966784 }
 0x150   :  { %406 = vsyncpa [#allocation3], 1 }
 0x151   :  { %407 = vsyncpa [#allocation6], 1 }
 0x152   :  { %408 = vsyncpa [#allocation4], 1 }
 0x153   :  { %409 = vsyncpa [#allocation9], 1 }

</bundles_post_ra>
